<compile_context>
chip_gen: v7x
topology: tpu7x:2x2x1
jax: 0.10.0
libtpu: 0.0.40
codegen_flags: <defaults>
</compile_context>

<pallas_src>
import jax
import jax.numpy as jnp
from jax.experimental import pallas as pl
from jax.experimental.pallas import tpu as pltpu

HIDDEN = 200
NUM_CLASSES = 14            # len(brcdLst)
PADDED_HIDDEN = 256         # 200 -> 256 (multiple of 128, matches MXU width)
PADDED_CLASSES = 128        # 14  -> 128 (lane-dense output stores)
TM_MAX = 2048               # upper bound on the batch tile (tunable)


def _round_up(v, m):
    return (v + m - 1) // m * m


def _pick_tm(batch, in_features):
    """Adaptive batch-tile size.

    - keeps the double-buffered f32 x tile within ~4 MiB of VMEM,
    - small batches: single tile rounded to 16 rows (bf16 sublane packing),
    - large batches: >= 2 grid steps (both v7x TensorCores) with tm derived
      from cdiv(batch, steps) so padding waste stays bounded.
    """
    cap = max(256, ((4 << 20) // max(4 * in_features, 1)) // 128 * 128)
    tm_max = min(TM_MAX, cap)
    if batch <= 512:
        return min(_round_up(max(batch, 1), 16), tm_max)
    steps = max(2, pl.cdiv(batch, tm_max))
    return min(tm_max, max(128, _round_up(pl.cdiv(batch, steps), 128)))


def _mlp_kernel(x_ref, w1_ref, b1_ref, w2_ref, b2_ref, o_ref, h_ref):
    # Cast the f32 x tile to bf16 in-kernel (no separate XLA convert pass).
    x = x_ref[...].astype(jnp.bfloat16)
    # First linear (MXU, bf16 x bf16 -> f32 accum) + bias + ReLU (VPU).
    h = jnp.dot(x, w1_ref[...], preferred_element_type=jnp.float32)
    h = jnp.maximum(h + b1_ref[...], 0.0)        # b1 (1, 256) broadcasts over rows
    # Dropout(p=0.5) in eval mode == identity (no mask, no scaling).
    # Stage hidden activation through bf16 VMEM scratch (controlled spill; bf16
    # is the operand the second MXU matmul consumes).
    h_ref[...] = h.astype(jnp.bfloat16)
    y = jnp.dot(h_ref[...], w2_ref[...], preferred_element_type=jnp.float32)
    o_ref[...] = (y + b2_ref[...]).astype(o_ref.dtype)    # bf16 logits out


def _pad_params(w1, b1, w2, b2):
    """Zero-pad logical params to lane-aligned shapes (numerically identical)."""
    in_features = w1.shape[0]
    w1p = jnp.zeros((in_features, PADDED_HIDDEN), jnp.float32).at[:, :HIDDEN].set(w1)
    b1p = jnp.zeros((1, PADDED_HIDDEN), jnp.float32).at[:, :HIDDEN].set(b1)
    w2p = jnp.zeros((PADDED_HIDDEN, PADDED_CLASSES), jnp.float32).at[:HIDDEN, :NUM_CLASSES].set(w2)
    b2p = jnp.zeros((1, PADDED_CLASSES), jnp.float32).at[:, :NUM_CLASSES].set(b2)
    return w1p, b1p, w2p, b2p


def neural_network_forward(x, w1, b1, w2, b2):
    """x: [batch, in_features] f32; w1:(in,200) b1:(1,200) w2:(200,14) b2:(1,14).

    Returns [batch, NUM_CLASSES] bf16 logits (bf16 operands / f32 accumulation).
    """
    batch, in_features = x.shape

    # Pad weights to 128-aligned shapes; matmul operands in bf16.
    w1p, b1p, w2p, b2p = _pad_params(w1, b1, w2, b2)
    w1p = w1p.astype(jnp.bfloat16)
    w2p = w2p.astype(jnp.bfloat16)

    tm = _pick_tm(batch, in_features)
    padded_batch = _round_up(batch, tm)
    if padded_batch != batch:
        x = jnp.pad(x, ((0, padded_batch - batch), (0, 0)))

    grid = (padded_batch // tm,)

    flops = 2 * padded_batch * (in_features * PADDED_HIDDEN
                                + PADDED_HIDDEN * PADDED_CLASSES)
    bytes_accessed = (padded_batch * in_features * 4            # x (f32 in)
                      + padded_batch * PADDED_CLASSES * 2       # logits (bf16 out)
                      + in_features * PADDED_HIDDEN * 2         # w1 (bf16)
                      + PADDED_HIDDEN * PADDED_CLASSES * 2      # w2 (bf16)
                      + (PADDED_HIDDEN + PADDED_CLASSES) * 4)   # biases (f32)

    out_padded = pl.pallas_call(
        _mlp_kernel,
        out_shape=jax.ShapeDtypeStruct((padded_batch, PADDED_CLASSES), jnp.bfloat16),
        grid=grid,
        in_specs=[
            # x: pipelined batch tiles (f32, cast in-kernel).
            pl.BlockSpec((tm, in_features), lambda i: (i, 0)),
            # Weights / biases: VMEM-resident across all grid steps.
            pl.BlockSpec((in_features, PADDED_HIDDEN), lambda i: (0, 0)),
            pl.BlockSpec((1, PADDED_HIDDEN), lambda i: (0, 0)),
            pl.BlockSpec((PADDED_HIDDEN, PADDED_CLASSES), lambda i: (0, 0)),
            pl.BlockSpec((1, PADDED_CLASSES), lambda i: (0, 0)),
        ],
        out_specs=pl.BlockSpec((tm, PADDED_CLASSES), lambda i: (i, 0)),
        scratch_shapes=[pltpu.VMEM((tm, PADDED_HIDDEN), jnp.bfloat16)],
        compiler_params=pltpu.CompilerParams(
            dimension_semantics=("parallel",)),
        cost_estimate=pl.CostEstimate(flops=flops, transcendentals=0,
                                      bytes_accessed=bytes_accessed),
    )(x, w1p, b1p, w2p, b2p)

    # Strip batch padding and the zero logit columns (bf16: half the bytes of
    # the previous f32 slice; fuses with the consumer when called inside jit).
    return out_padded[:batch, :NUM_CLASSES]


def init_params(key, in_features):
    """Deterministic logical params (stand-in for the lazily-initialized torch Linears)."""
    k1, k2, k3, k4 = jax.random.split(key, 4)
    bound1 = 1.0 / jnp.sqrt(in_features)
    bound2 = 1.0 / jnp.sqrt(HIDDEN)
    w1 = jax.random.uniform(k1, (in_features, HIDDEN), jnp.float32, -bound1, bound1)
    b1 = jax.random.uniform(k2, (1, HIDDEN), jnp.float32, -bound1, bound1)
    w2 = jax.random.uniform(k3, (HIDDEN, NUM_CLASSES), jnp.float32, -bound2, bound2)
    b2 = jax.random.uniform(k4, (1, NUM_CLASSES), jnp.float32, -bound2, bound2)
    return w1, b1, w2, b2


if __name__ == "__main__":
    key = jax.random.PRNGKey(0)
    k_x, k_p = jax.random.split(key)

    batch, in_features = 8, 32  # LazyLinear infers in_features from the input
    x = jax.random.normal(k_x, (batch, in_features), jnp.float32)
    w1, b1, w2, b2 = init_params(k_p, in_features)

    out = neural_network_forward(x, w1, b1, w2, b2)
    out = jax.block_until_ready(out)

    # Pure-JAX reference with matching bf16 operand precision / f32 accumulation
    # and a bf16 final cast.
    xb = x.astype(jnp.bfloat16).astype(jnp.float32)
    w1b = w1.astype(jnp.bfloat16).astype(jnp.float32)
    w2b = w2.astype(jnp.bfloat16).astype(jnp.float32)
    h = jnp.maximum(xb @ w1b + b1, 0.0)
    h = h.astype(jnp.bfloat16).astype(jnp.float32)
    ref = (h @ w2b + b2).astype(jnp.bfloat16).astype(jnp.float32)

    assert out.shape == (batch, NUM_CLASSES)
    assert out.dtype == jnp.bfloat16
    diff = jnp.max(jnp.abs(out.astype(jnp.float32) - ref))
    assert jnp.allclose(out.astype(jnp.float32), ref, atol=5e-2, rtol=5e-2), float(diff)

    print("KERNEL_OK")
</pallas_src>

<mosaic_0001>
module attributes {stable_mosaic.version = 11 : i64} {
  func.func @_mlp_kernel(%arg0: i32, %arg1: memref<16x32xf32, #tpu.memory_space<vmem>>, %arg2: memref<32x256xbf16, #tpu.memory_space<vmem>>, %arg3: memref<1x256xf32, #tpu.memory_space<vmem>>, %arg4: memref<256x128xbf16, #tpu.memory_space<vmem>>, %arg5: memref<1x128xf32, #tpu.memory_space<vmem>>, %arg6: memref<16x128xbf16, #tpu.memory_space<vmem>>, %arg7: memref<16x256xbf16, #tpu.memory_space<vmem>>) attributes {dimension_semantics = [#tpu.dimension_semantics<parallel>], iteration_bounds = array<i64: 1>, scalar_prefetch = 0 : i64, scratch_operands = 1 : i64, tpu.core_type = #tpu.core_type<tc>, window_params = [{transform_indices = @transform_0, window_bounds = array<i64: 16, 32>}, {pipeline_mode = #tpu.pipeline_mode<synchronous>, transform_indices = @transform_1, window_bounds = array<i64: 32, 256>}, {pipeline_mode = #tpu.pipeline_mode<synchronous>, transform_indices = @transform_2, window_bounds = array<i64: 1, 256>}, {pipeline_mode = #tpu.pipeline_mode<synchronous>, transform_indices = @transform_3, window_bounds = array<i64: 256, 128>}, {pipeline_mode = #tpu.pipeline_mode<synchronous>, transform_indices = @transform_4, window_bounds = array<i64: 1, 128>}, {transform_indices = @transform_5, window_bounds = array<i64: 16, 128>}]} {
    %c0 = arith.constant 0 : index
    %c0_0 = arith.constant 0 : index
    %0 = vector.load %arg1[%c0, %c0_0] : memref<16x32xf32, #tpu.memory_space<vmem>>, vector<16x32xf32>
    %1 = arith.truncf %0 : vector<16x32xf32> to vector<16x32xbf16>
    %c0_1 = arith.constant 0 : index
    %c0_2 = arith.constant 0 : index
    %2 = vector.load %arg2[%c0_1, %c0_2] : memref<32x256xbf16, #tpu.memory_space<vmem>>, vector<32x256xbf16>
    %cst = arith.constant dense<0.000000e+00> : vector<16x256xf32>
    %3 = tpu.matmul %1, %2, %cst {dimension_numbers = #tpu.dot_dimension_numbers<[1], [0], [0], [1], [0, 0, 1, 1], [], []>} : vector<16x32xbf16>, vector<32x256xbf16>, vector<16x256xf32> -> vector<16x256xf32>
    %c0_3 = arith.constant 0 : index
    %c0_4 = arith.constant 0 : index
    %4 = vector.load %arg3[%c0_3, %c0_4] : memref<1x256xf32, #tpu.memory_space<vmem>>, vector<1x256xf32>
    %5 = vector.broadcast %4 : vector<1x256xf32> to vector<16x256xf32>
    %6 = arith.addf %3, %5 : vector<16x256xf32>
    %cst_5 = arith.constant 0.000000e+00 : f32
    %7 = vector.broadcast %cst_5 : f32 to vector<16x256xf32>
    %8 = arith.maximumf %6, %7 : vector<16x256xf32>
    %9 = arith.truncf %8 : vector<16x256xf32> to vector<16x256xbf16>
    %c0_6 = arith.constant 0 : index
    %c0_7 = arith.constant 0 : index
    %10 = vector.load %arg7[%c0_6, %c0_7] : memref<16x256xbf16, #tpu.memory_space<vmem>>, vector<16x256xbf16>
    tpu.vector_store %arg7[%c0_6, %c0_7], %9 {strides = array<i32>} : memref<16x256xbf16, #tpu.memory_space<vmem>>, vector<16x256xbf16>,
    %c0_8 = arith.constant 0 : index
    %c0_9 = arith.constant 0 : index
    %11 = vector.load %arg7[%c0_8, %c0_9] : memref<16x256xbf16, #tpu.memory_space<vmem>>, vector<16x256xbf16>
    %c0_10 = arith.constant 0 : index
    %c0_11 = arith.constant 0 : index
    %12 = vector.load %arg4[%c0_10, %c0_11] : memref<256x128xbf16, #tpu.memory_space<vmem>>, vector<256x128xbf16>
    %cst_12 = arith.constant dense<0.000000e+00> : vector<16x128xf32>
    %13 = tpu.matmul %11, %12, %cst_12 {dimension_numbers = #tpu.dot_dimension_numbers<[1], [0], [0], [1], [0, 0, 1, 1], [], []>} : vector<16x256xbf16>, vector<256x128xbf16>, vector<16x128xf32> -> vector<16x128xf32>
    %c0_13 = arith.constant 0 : index
    %c0_14 = arith.constant 0 : index
    %14 = vector.load %arg5[%c0_13, %c0_14] : memref<1x128xf32, #tpu.memory_space<vmem>>, vector<1x128xf32>
    %15 = vector.broadcast %14 : vector<1x128xf32> to vector<16x128xf32>
    %16 = arith.addf %13, %15 : vector<16x128xf32>
    %17 = arith.truncf %16 : vector<16x128xf32> to vector<16x128xbf16>
    %c0_15 = arith.constant 0 : index
    %c0_16 = arith.constant 0 : index
    %18 = vector.load %arg6[%c0_15, %c0_16] : memref<16x128xbf16, #tpu.memory_space<vmem>>, vector<16x128xbf16>
    tpu.vector_store %arg6[%c0_15, %c0_16], %17 {strides = array<i32>} : memref<16x128xbf16, #tpu.memory_space<vmem>>, vector<16x128xbf16>,
    return
  }
  func.func @transform_0(%arg0: i32) -> (i32, i32) {
    %c0_i32 = arith.constant 0 : i32
    %c0_i32_0 = arith.constant 0 : i32
    return %arg0, %c0_i32 : i32, i32
  }
  func.func @transform_1(%arg0: i32) -> (i32, i32) {
    %c0_i32 = arith.constant 0 : i32
    %c0_i32_0 = arith.constant 0 : i32
    %c0_i32_1 = arith.constant 0 : i32
    return %c0_i32, %c0_i32_0 : i32, i32
  }
  func.func @transform_2(%arg0: i32) -> (i32, i32) {
    %c0_i32 = arith.constant 0 : i32
    %c0_i32_0 = arith.constant 0 : i32
    %c0_i32_1 = arith.constant 0 : i32
    return %c0_i32, %c0_i32_0 : i32, i32
  }
  func.func @transform_3(%arg0: i32) -> (i32, i32) {
    %c0_i32 = arith.constant 0 : i32
    %c0_i32_0 = arith.constant 0 : i32
    %c0_i32_1 = arith.constant 0 : i32
    return %c0_i32, %c0_i32_0 : i32, i32
  }
  func.func @transform_4(%arg0: i32) -> (i32, i32) {
    %c0_i32 = arith.constant 0 : i32
    %c0_i32_0 = arith.constant 0 : i32
    %c0_i32_1 = arith.constant 0 : i32
    return %c0_i32, %c0_i32_0 : i32, i32
  }
  func.func @transform_5(%arg0: i32) -> (i32, i32) {
    %c0_i32 = arith.constant 0 : i32
    %c0_i32_0 = arith.constant 0 : i32
    return %arg0, %c0_i32 : i32, i32
  }
}

</mosaic_0001>

<bundles_post_ra>
// kernel: tpu_custom_call.1
= control target key start
LH: loop header
LB: loop body
LE: loop exit
PB: predicated region body
PF: predicated region fallthrough
CT: control target
= control target key end

     0   :  { %10 = vsyncpa [#allocation4], 0  ;;  %s647_s0 = inlined_call_operand.hbm [shape: f32[16,32], index: 0, kind: input, shape index: {}]   ;;  %s648_s1 = inlined_call_operand.hbm [shape: bf16[32,256], index: 1, kind: input, shape index: {}]   ;;  %s649_s2 = inlined_call_operand.vmem [shape: f32[1,256], index: 2, kind: input, shape index: {}]   ;;  %s650_s3 = inlined_call_operand.hbm [shape: bf16[256,128], index: 3, kind: input, shape index: {}]   ;;  %s651_s4 = inlined_call_operand.vmem [shape: f32[1,128], index: 4, kind: input, shape index: {}]   ;;  %s652_s5 = inlined_call_operand.hbm [shape: bf16[16,128], index: 5, kind: output, shape index: {}]  }
   0x1   :  { %11 = vsyncpa [#allocation7], 0 }
   0x2   :  { %12 = vsyncpa [#allocation5], 0  ;;  %s541_s18 = smov [#allocation6]   ;;  %s542_s20 = smov [#allocation3]  }
   0x3   :  { %s30_s19 = sshll.u32 %s541_s18, 4  ;;  %s18_s21 = sshll.u32 %s542_s20, 4  ;;  %s31_s19 = int_to_ptr.vmem [resolvable:$true] %s30_s19  ;;  %s580_s21 = int_to_ptr.vmem [resolvable:$true] %s18_s21 }
   0x4   :  { %s447_s24 = scalar_lea.hbm %s648_s1, 512 }
   0x5   :  { %p448_p0 = scmp.ne.s32.totalorder %s648_s1, %s447_s24  ;;  %p451_p1 = scmp.lt.u32.totalorder %s447_s24, %s648_s1 }
   0x7   :  { %p453_p2 = pnand %p451_p1, %p448_p0 }
   0x9   :  { %456 = shalt.err (!%p453_p2)
}
   0xa   :  { %s457_s29 = scalar_lea.vmem %s31_s19, 512  ;;  %p462_p4 = scmp.lt.s32.totalorder %s31_s19, %s31_s19 }
   0xb   :  { %p458_p3 = scmp.ne.s32.totalorder %s31_s19, %s457_s29  ;;  %p463_p5 = scmp.lt.s32.totalorder %s457_s29, %s457_s29 }
   0xd   :  { %p464_p6 = por %p463_p5, %p462_p4 }
   0xf   :  { %p465_p7 = pnand %p464_p6, %p458_p3 }
  0x11   :  { %468 = shalt.err (!%p465_p7)
}
  0x12   :  { %s543_s30 = smov 128   ;;  %s544_s6 = smov 8  }
  0x13   :  { %36 = dma.hbm_to_vmem [thread:$0]  %s648_s1, 512, %s31_s19, [#allocation7], %s543_s30, %s543_s30, %s544_s6  }
  0x14   :  { %s469_s11 = scalar_lea.hbm %s647_s0, 256 }
  0x15   :  { %p470_p8 = scmp.ne.s32.totalorder %s647_s0, %s469_s11  ;;  %p473_p9 = scmp.lt.u32.totalorder %s469_s11, %s647_s0 }
  0x17   :  { %p475_p10 = pnand %p473_p9, %p470_p8 }
  0x19   :  { %478 = shalt.err (!%p475_p10)
}
  0x1a   :  { %s479_s16 = scalar_lea.vmem %s580_s21, 256  ;;  %p484_p12 = scmp.lt.s32.totalorder %s580_s21, %s580_s21 }
  0x1b   :  { %p480_p11 = scmp.ne.s32.totalorder %s580_s21, %s479_s16  ;;  %p485_p13 = scmp.lt.s32.totalorder %s479_s16, %s479_s16 }
  0x1d   :  { %p486_p0 = por %p485_p13, %p484_p12 }
  0x1f   :  { %p487_p1 = pnand %p486_p0, %p480_p11 }
  0x21   :  { %490 = shalt.err (!%p487_p1)
}
  0x22   :  { %24 = dma.hbm_to_vmem [thread:$0]  %s647_s0, 256, %s580_s21, [#allocation4], %s543_s30, %s543_s30, %s544_s6  }
  0x23   :  { %s545_s18 = smov [#allocation8]   ;;  %s491_s23 = scalar_lea.hbm %s650_s3, 2048 }
  0x24   :  { %s44_s19 = sshll.u32 %s545_s18, 4  ;;  %p492_p2 = scmp.ne.s32.totalorder %s650_s3, %s491_s23  ;;  %s45_s19 = int_to_ptr.vmem [resolvable:$true] %s44_s19 }
  0x25   :  { %p495_p3 = scmp.lt.u32.totalorder %s491_s23, %s650_s3 }
  0x27   :  { %p497_p4 = pnand %p495_p3, %p492_p2 }
  0x29   :  { %500 = shalt.err (!%p497_p4)
}
  0x2a   :  { %s501_s28 = scalar_lea.vmem %s45_s19, 2048  ;;  %p506_p6 = scmp.lt.s32.totalorder %s45_s19, %s45_s19 }
  0x2b   :  { %p502_p5 = scmp.ne.s32.totalorder %s45_s19, %s501_s28  ;;  %p507_p7 = scmp.lt.s32.totalorder %s501_s28, %s501_s28 }
  0x2d   :  { %p508_p8 = por %p507_p7, %p506_p6 }
  0x2f   :  { %p509_p9 = pnand %p508_p8, %p502_p5 }
  0x31   :  { %512 = shalt.err (!%p509_p9)
}
  0x32   :  { %s546_s0 = smov 64   ;;  %s547_s21 = smov 4  }
  0x33   :  { %50 = dma.hbm_to_vmem [thread:$0]  %s650_s3, 2048, %s45_s19, [#allocation7], %s546_s0, %s546_s0, %s547_s21  }
  0x34   :  { %535 = dma.done.wait [#allocation4], 256  }
  0x35   :  { %536 = vsyncadd [#allocation4], 4294967040 }
  0x36   :  { %537 = dma.done.wait [#allocation7], 2560  }
  0x37   :  { %538 = vsyncadd [#allocation7], 4294964736  ;;  %v548_v0 = vmov 0   ;;  %v425_v1 = vld [vmem:[#allocation6 + $0x4] ss:$8 sps:$4 sm:$0xff]   ;;  %v63_v5 = vld [vmem:[#allocation3] sm:$0xff]  ;;  %v72_v24 = vlaneseq }
  0x38   :  { %138 = vmatprep.mubr.bf16.mxu0 %v548_v0  ;;  %v427_v2 = vld [vmem:[#allocation6] ss:$8 sps:$4 sm:$0xff]   ;;  %106 = vmatprep.subr.bf16.mxu0 %v425_v1  ;;  %v428_v3 = vld [vmem:[#allocation6 + $0x14] ss:$8 sps:$4 sm:$0xff]   ;;  %v430_v4 = vld [vmem:[#allocation6 + $0x10] ss:$8 sps:$4 sm:$0xff]  }
  0x39   :  { %107 = vmatpush1.bf16.msra.mxu0 %v427_v2  ;;  %v64_v6 = vld [vmem:[#allocation3 + $0x8] sm:$0xff]  ;;  %v431_v7 = vld [vmem:[#allocation8 + $0x40] sm:$0xff]   ;;  %v433_v10 = vld [vmem:[#allocation8 + $0x48] sm:$0xff]   ;;  %vm102_vm0 = vcmask 261120   ;;  %v73_v25 = vshrl.u32 %v72_v24, 7  ;;  %s549_s8 = smov [#allocation9]  }
  0x3a   :  { %108 = vmatprep.subr.bf16.mxu0 %v428_v3  ;;  %v432_v8 = vld [vmem:[#allocation8] sm:$0xff]   ;;  %v65_v9 = vpack.c.bf16 %v64_v6, %v63_v5  ;;  %394 = vmatprep.subr.bf16.mxu1 %v431_v7  ;;  %v434_v11 = vld [vmem:[#allocation8 + $0x8] sm:$0xff]   ;;  %v435_v12 = vld [vmem:[#allocation8 + $0x50] sm:$0xff]   ;;  %s350_s9 = sshll.u32 %s549_s8, 4  ;;  %s351_s9 = int_to_ptr.vmem [resolvable:$true] %s350_s9 }
  0x3b   :  { %395 = vmatpush3.bf16.msra.mxu1 %v432_v8  ;;  %v436_v13 = vld [vmem:[#allocation8 + $0x10] sm:$0xff]   ;;  %v437_v14 = vld [vmem:[#allocation8 + $0x58] sm:$0xff]   ;;  %v439_v16 = vld [vmem:[#allocation8 + $0x60] sm:$0xff]   ;;  %v74_v26 = vsub.s32 0, %v73_v25  ;;  %v78_v28 = vsub.s32 1, %v73_v25  ;;  %s513_s10 = scalar_lea.vmem %s351_s9, 128  ;;  %p518_p11 = scmp.lt.s32.totalorder %s351_s9, %s351_s9 }
  0x3c   :  { %396 = vmatprep.subr.bf16.mxu1 %v433_v10  ;;  %v438_v15 = vld [vmem:[#allocation8 + $0x18] sm:$0xff]   ;;  %v440_v17 = vld [vmem:[#allocation8 + $0x20] sm:$0xff]   ;;  %v441_v18 = vld [vmem:[#allocation8 + $0x68] sm:$0xff]   ;;  %p514_p10 = scmp.ne.s32.totalorder %s351_s9, %s513_s10  ;;  %p519_p12 = scmp.lt.s32.totalorder %s513_s10, %s513_s10 }
  0x3d   :  { %109 = vmatpush1.bf16.msra.mxu0 %v430_v4  ;;  %v442_v19 = vld [vmem:[#allocation8 + $0x28] sm:$0xff]   ;;  %v443_v20 = vld [vmem:[#allocation8 + $0x70] sm:$0xff]   ;;  %v445_v22 = vld [vmem:[#allocation8 + $0x78] sm:$0xff]  }
  0x3e   :  { %v444_v21 = vld [vmem:[#allocation8 + $0x30] sm:$0xff]   ;;  %v446_v23 = vld [vmem:[#allocation8 + $0x38] sm:$0xff]   ;;  %p520_p13 = por %p519_p12, %p518_p11 }
  0x3f   :  { %397 = vmatpush3.bf16.msra.mxu1 %v434_v11  ;;  %v70_v27 = vld [vmem:[%s649_s2] sm:$0x3] }
  0x40   :  { %367 = vmatmul.mubr.msk.bf16.vlgmr.msra.gmra.mrb[0].mxu0 %vm102_vm0, %v65_v9  ;;  %398 = vmatprep.subr.bf16.mxu1 %v435_v12  ;;  %v75_v29 = vrot.slane %v70_v27, %v74_v26  ;;  %v79_v30 = vrot.slane %v70_v27, %v78_v28  ;;  %v368_v49 = vld [vmem:[%s651_s4] ss:$0 sm:$0xff]  ;;  %p521_p0 = pnand %p520_p13, %p514_p10 }
  0x43   :  { %399 = vmatpush3.bf16.msra.mxu1 %v436_v13 }
  0x44   :  { %400 = vmatprep.subr.bf16.mxu1 %v437_v14 }
  0x47   :  { %401 = vmatpush3.bf16.msra.mxu1 %v438_v15 }
  0x48   :  { %402 = vmatprep.subr.bf16.mxu1 %v439_v16 }
  0x4b   :  { %403 = vmatpush3.bf16.msra.mxu1 %v440_v17 }
  0x4c   :  { %404 = vmatprep.subr.bf16.mxu1 %v441_v18 }
  0x4f   :  { %405 = vmatpush3.bf16.msra.mxu1 %v442_v19 }
  0x50   :  { %406 = vmatprep.subr.bf16.mxu1 %v443_v20 }
  0x53   :  { %407 = vmatpush3.bf16.msra.mxu1 %v444_v21 }
  0x54   :  { %408 = vmatprep.subr.bf16.mxu1 %v445_v22 }
  0x57   :  { %409 = vmatpush3.bf16.msra.mxu1 %v446_v23 }
 0x113   :  { %v140_v31 = vpop.f32.mrb[0].mxu0 }
 0x114   :  { %v141_v32 = vadd.f32 %v140_v31, %v75_v29  ;;  %v142_v33 = vpop.f32.mrb[1].mxu0 }
 0x115   :  { %v143_v34 = vadd.f32 %v142_v33, %v79_v30  ;;  %v144_v35 = vpop.f32.mrb[2].mxu0 }
 0x116   :  { %v145_v36 = vadd.f32 %v144_v35, %v75_v29  ;;  %v146_v37 = vpop.f32.mrb[3].mxu0  ;;  %v149_v39 = vmax.f32 %v141_v32, 0.0 }
 0x117   :  { %v147_v38 = vadd.f32 %v146_v37, %v79_v30  ;;  %v150_v41 = vmax.f32 %v143_v34, 0.0 }
 0x118   :  { %v151_v40 = vmax.f32 %v145_v36, 0.0 }
 0x119   :  { %v152_v42 = vmax.f32 %v147_v38, 0.0 }
 0x11a   :  { %v153_v43 = vpack.c.bf16 %v151_v40, %v149_v39 }
 0x11b   :  { %v154_v44 = vpack.c.bf16 %v152_v42, %v150_v41 }
 0x11d   :  { %326 = vmatprep.mubr.bf16.mxu1 %v154_v44 }
 0x11e   :  { %327 = vmatmul.mubr.bf16.vlgmr.msra.gmra.mrb[0].mxu1 %v153_v43 }
 0x1f1   :  { %v410_v45 = vpop.f32.mrb[0].mxu1 }
 0x1f2   :  { %v411_v46 = vpop.f32.mrb[1].mxu1 }
 0x1f3   :  { %v412_v47 = vadd.f32 %v411_v46, %v410_v45  ;;  %v413_v48 = vpop.f32.mrb[2].mxu1 }
 0x1f4   :  { %v414_v50 = vpop.f32.mrb[3].mxu1 }
 0x1f5   :  { %v415_v51 = vadd.f32 %v414_v50, %v413_v48  ;;  %v329_v52 = vadd.f32 %v412_v47, %v368_v49 }
 0x1f7   :  { %v332_v53 = vadd.f32 %v415_v51, %v368_v49 }
 0x1f9   :  { %v392_v54 = vpack.c.bf16 %v332_v53, %v329_v52 }
 0x1fb   :  { %393 = vst [vmem:[#allocation9] sm:$0xff] %v392_v54  }
 0x1fc   :  { %524 = shalt.err (!%p521_p0)
}
 0x1fd   :  { %s525_s4 = scalar_lea.hbm %s652_s5, 128 }
 0x1fe   :  { %p526_p1 = scmp.ne.s32.totalorder %s652_s5, %s525_s4  ;;  %p529_p2 = scmp.lt.u32.totalorder %s525_s4, %s652_s5 }
 0x200   :  { %p531_p3 = pnand %p529_p2, %p526_p1 }
 0x202   :  { %534 = shalt.err (!%p531_p3)
}
 0x203   :  { %356 = dma.vmem_to_hbm [thread:$0]  %s351_s9, 128, %s652_s5, [#allocation5], %s546_s0, %s546_s0, %s547_s21  }
 0x204   :  { %539 = dma.done.wait [#allocation5], 128  }
 0x205   :  { %540 = vsyncadd [#allocation5], 4294967168 }
 0x206   :  { %360 = vsyncpa [#allocation4], 1 }
 0x207   :  { %361 = vsyncpa [#allocation7], 1 }
 0x208   :  { %362 = vsyncpa [#allocation5], 1 }

</bundles_post_ra>
